<compile_context>
chip_gen: v5e
topology: v5e:2x2
jax: 0.10.0
libtpu: 0.0.40
codegen_flags: <defaults>
</compile_context>

<pallas_src>
import jax
import jax.numpy as jnp
from jax.experimental import pallas as pl
from jax.experimental.pallas import tpu as pltpu


# ----------------------------------------------------------------------------
# Kernel A: encoder -> reparametrize -> decoder hidden layers (small matmuls,
# everything fits comfortably in VMEM at any realistic dim[0..2]).
# ----------------------------------------------------------------------------
def encoder_latent_kernel(hsum_ref, w1_ref, b1_ref, headw_ref, eps_ref,
                          w3_ref, b3_ref, w4_ref, b4_ref,
                          stats_ref, h4_ref):
    f32 = jnp.float32
    d2 = eps_ref.shape[-1]

    # h = relu(emb(x + 1).sum(1))   (the gather+sum is fed in as hsum)
    h0 = jnp.maximum(hsum_ref[...], 0.0)
    # h = relu(w1(h))
    h1 = jnp.maximum(
        jnp.dot(h0, w1_ref[...], preferred_element_type=f32) + b1_ref[...], 0.0)

    # Fused mu/logvar head: one lane-dense (B, 2*d2) MXU push.
    # mu.bias / logvar.bias are fill_(0) in the module -> the (zero) add is dropped.
    stats = jnp.dot(h1, headw_ref[...], preferred_element_type=f32)
    mu = stats[:, :d2]
    logvar = stats[:, d2:]

    # z = mu + exp(0.5 * logvar) * eps
    # TODO(synk): eps could be drawn in-kernel (pltpu.prng_seed + stateful_normal);
    # it is passed in to mirror torch.randn_like deterministically.
    z = mu + jnp.exp(0.5 * logvar) * eps_ref[...]

    # decoder hidden layers: h3 = relu(w3 z), h4 = relu(w4 h3)
    h3 = jnp.maximum(
        jnp.dot(z, w3_ref[...], preferred_element_type=f32) + b3_ref[...], 0.0)
    h4 = jnp.maximum(
        jnp.dot(h3, w4_ref[...], preferred_element_type=f32) + b4_ref[...], 0.0)

    stats_ref[...] = stats
    h4_ref[...] = h4.astype(h4_ref.dtype)          # emit bf16 for Kernel B


# ----------------------------------------------------------------------------
# Kernel B: output projection xhat = h4 @ inv_w + inv_b, tiled over the songs
# axis.  inv_w is pre-tiled (num_tiles, d0, tn) int8; per-column f32 scales are
# folded into the bias-add epilogue; f32 accumulation on the MXU.
# ----------------------------------------------------------------------------
def decoder_out_kernel(h4_ref, invw_ref, scale_ref, invb_ref, xhat_ref):
    # int8 -> f32 -> bf16: values in [-127,127] are exact in bf16; the two-step
    # cast lowers robustly on Mosaic and the VPU work is hidden behind the DMA.
    w = invw_ref[0].astype(jnp.float32).astype(jnp.bfloat16)      # (d0, tn)
    acc = jnp.dot(h4_ref[...], w, preferred_element_type=jnp.float32)
    xhat_ref[...] = acc * scale_ref[0] + invb_ref[0]


# ----------------------------------------------------------------------------
# Forward wrapper
# ----------------------------------------------------------------------------
def vae_forward(x, params, eps, *, nsongs):
    """x: (B, SEQ) int32 song ids (-1 = padding), eps: (B, d2) f32 noise."""
    B = x.shape[0]
    d0, d1 = params["w1_w"].shape
    d2 = eps.shape[1]
    num_tiles, d0w, tn = params["inv_w_q"].shape
    assert d0w == d0
    npad = num_tiles * tn
    assert npad >= nsongs

    # ---- embedding bag: gather + sum -----------------------------------
    # emb(x+1).sum(1); pad sentinel -1 -> row 0 of emb_w, which is zero.
    idx = x + 1
    hsum = jnp.take(params["emb_w"], idx, axis=0).astype(jnp.float32).sum(axis=1)

    # ---- kernel A: encoder + reparametrize + decoder hidden ----------------
    vmem = pl.BlockSpec(memory_space=pltpu.MemorySpace.VMEM)
    enc_args = (hsum, params["w1_w"], params["w1_b"], params["head_w"], eps,
                params["w3_w"], params["w3_b"], params["w4_w"], params["w4_b"])
    flops_a = int(2 * B * (d0 * d1 + d1 * (2 * d2) + d2 * d1 + d1 * d0))
    bytes_a = int(sum(int(a.size) * a.dtype.itemsize for a in enc_args)
                  + 4 * B * 2 * d2 + 2 * B * d0)
    stats, h4 = pl.pallas_call(
        encoder_latent_kernel,
        out_shape=(jax.ShapeDtypeStruct((B, 2 * d2), jnp.float32),   # mu | logvar
                   jax.ShapeDtypeStruct((B, d0), jnp.bfloat16)),      # h4 (bf16)
        in_specs=[vmem] * len(enc_args),
        out_specs=(vmem, vmem),
        cost_estimate=pl.CostEstimate(flops=flops_a, transcendentals=B * d2,
                                      bytes_accessed=bytes_a),
    )(*enc_args)

    # ---- kernel B: tiled output projection over the (padded) songs axis ----
    # Weight tiles are fully contiguous (pre-tiled layout) and int8 (half the
    # HBM stream).  "parallel" songs axis -> megacore split on v7x.
    flops_b = int(2 * B * d0 * npad)
    bytes_b = int(B * d0 * 2 + d0 * npad * 1 + 2 * npad * 4 + B * npad * 4)
    xhat_pad = pl.pallas_call(
        decoder_out_kernel,
        out_shape=jax.ShapeDtypeStruct((B, npad), jnp.float32),
        grid=(num_tiles,),
        in_specs=[
            pl.BlockSpec((B, d0), lambda j: (0, 0)),       # h4: resident across tiles
            pl.BlockSpec((1, d0, tn), lambda j: (j, 0, 0)),  # int8 weight tile (contiguous DMA)
            pl.BlockSpec((1, 1, tn), lambda j: (j, 0, 0)),   # per-column scale tile
            pl.BlockSpec((1, 1, tn), lambda j: (j, 0, 0)),   # bias tile
        ],
        out_specs=pl.BlockSpec((B, tn), lambda j: (0, j)),
        compiler_params=pltpu.CompilerParams(
            dimension_semantics=("parallel",),
            # 32 MiB scoped VMEM: at tn=4096 the double-buffered int8 weight
            # tiles are 2 MiB + 256 KiB f32 output buffers -> large headroom.
            # v7x ceiling: tn <= 8192 recommended (<= 16384 hard), keep
            # num_tiles >= 8 for 2-TensorCore load balance.
            vmem_limit_bytes=32 * 1024 * 1024),
        cost_estimate=pl.CostEstimate(flops=flops_b, transcendentals=0,
                                      bytes_accessed=bytes_b),
    )(h4, params["inv_w_q"], params["inv_scale"], params["inv_b"])

    mu = stats[:, :d2]
    logvar = stats[:, d2:]
    xhat = xhat_pad[:, :nsongs]
    return xhat, (mu, logvar)


# ----------------------------------------------------------------------------
# Parameter construction (deterministic, synthetic -- no checkpoint load)
# ----------------------------------------------------------------------------
def init_params(key, nsongs, dim, *, tn=4096):
    d0, d1, d2 = dim
    ks = jax.random.split(key, 12)

    def lin_w(k, fan_in, fan_out, dtype=jnp.float32):
        bound = 1.0 / jnp.sqrt(fan_in)
        w = jax.random.uniform(k, (fan_in, fan_out), jnp.float32, -bound, bound)
        return w.astype(dtype)

    def lin_b(k, fan_in, fan_out):
        bound = 1.0 / jnp.sqrt(fan_in)
        return jax.random.uniform(k, (1, fan_out), jnp.float32, -bound, bound)

    # Embedding: padding_idx=0 and the forward's `emb.weight[0] = 0`.
    emb_w = jax.random.normal(ks[0], (nsongs + 1, d0), jnp.float32) * 0.1
    emb_w = emb_w.at[0].set(0.0).astype(jnp.bfloat16)

    # Fused mu/logvar head weight (biases are zero per the module's __init__).
    head_w = jnp.concatenate([lin_w(ks[3], d1, d2), lin_w(ks[4], d1, d2)], axis=1)

    # Output projection: pad songs axis to a multiple of tn, quantize to int8
    # with per-column scales, and pre-tile to (num_tiles, d0, tn) so each
    # weight tile is a single contiguous DMA.
    npad = pl.cdiv(nsongs, tn) * tn
    num_tiles = npad // tn
    inv_w = jnp.pad(lin_w(ks[9], d0, nsongs), ((0, 0), (0, npad - nsongs)))
    amax = jnp.max(jnp.abs(inv_w), axis=0, keepdims=True)            # (1, npad)
    inv_scale = jnp.where(amax > 0.0, amax / 127.0, 1.0)
    inv_w_q = jnp.clip(jnp.round(inv_w / inv_scale), -127, 127).astype(jnp.int8)
    inv_w_q = inv_w_q.reshape(d0, num_tiles, tn).transpose(1, 0, 2)   # (nt, d0, tn)
    inv_scale = inv_scale.reshape(1, num_tiles, tn).transpose(1, 0, 2)  # (nt, 1, tn)

    # TODO(synk): original loads inv.bias from 'results/metadata/bias_inicialization';
    # initialized deterministically here instead.
    inv_b = jnp.pad(jax.random.normal(ks[10], (1, nsongs), jnp.float32) * 0.01,
                    ((0, 0), (0, npad - nsongs)))
    inv_b = inv_b.reshape(1, num_tiles, tn).transpose(1, 0, 2)        # (nt, 1, tn)

    return {
        "emb_w": emb_w,
        "w1_w": lin_w(ks[1], d0, d1), "w1_b": lin_b(ks[2], d0, d1),
        "head_w": head_w,
        "w3_w": lin_w(ks[5], d2, d1), "w3_b": lin_b(ks[6], d2, d1),
        "w4_w": lin_w(ks[7], d1, d0), "w4_b": lin_b(ks[8], d1, d0),
        "inv_w_q": inv_w_q, "inv_scale": inv_scale, "inv_b": inv_b,
    }


# ----------------------------------------------------------------------------
# Pure-JAX reference (same numerics: bf16 emb/h4, int8+scale inv_w, f32 accum)
# ----------------------------------------------------------------------------
def reference_forward(x, params, eps, nsongs):
    f32 = jnp.float32
    d2 = eps.shape[1]
    emb = params["emb_w"].astype(f32)
    h = jnp.take(emb, x + 1, axis=0).sum(axis=1)
    h = jnp.maximum(h, 0.0)
    h = jnp.maximum(h @ params["w1_w"] + params["w1_b"], 0.0)
    stats = h @ params["head_w"]
    mu, logvar = stats[:, :d2], stats[:, d2:]
    z = mu + jnp.exp(0.5 * logvar) * eps
    h3 = jnp.maximum(z @ params["w3_w"] + params["w3_b"], 0.0)
    h4 = jnp.maximum(z @ params["w3_w"] @ jnp.eye(params["w3_w"].shape[1]) * 0 + h3, 0.0)  # = h3
    h4 = jnp.maximum(h3 @ params["w4_w"] + params["w4_b"], 0.0)
    h4b = h4.astype(jnp.bfloat16).astype(f32)
    nt, d0, tn = params["inv_w_q"].shape
    npad = nt * tn
    W = params["inv_w_q"].astype(f32).transpose(1, 0, 2).reshape(d0, npad)
    S = params["inv_scale"].transpose(1, 0, 2).reshape(1, npad)
    Bb = params["inv_b"].transpose(1, 0, 2).reshape(1, npad)
    xhat = (h4b @ W) * S + Bb
    return xhat[:, :nsongs], mu, logvar


# ----------------------------------------------------------------------------
# Main
# ----------------------------------------------------------------------------
if __name__ == "__main__":
    # Small shapes consistent with the module's forward ('sum' reduction, tag=None).
    # TODO(synk): 'mean'/'attention' reductions and the tag / z_tag path not implemented.
    B, SEQ = 8, 8
    Nsongs = 10000                   # real model ~181497; padded to a multiple of TN
    dim = (256, 128, 64)             # (dim[0], dim[1], dim[2]); 2*dim[2] = 128 lane-dense head
    TN = 4096                        # production default; v7x: tn<=8192 and num_tiles>=8

    key = jax.random.PRNGKey(0)
    k_x, k_p, k_eps = jax.random.split(key, 3)

    # x: playlist of song ids in [0, Nsongs); padding sentinel is -1 so x+1 == 0
    # hits the zeroed embedding row (padding_idx=0), matching the module.
    x = jax.random.randint(k_x, (B, SEQ), 0, Nsongs, dtype=jnp.int32)
    x = jnp.where(jnp.arange(SEQ)[None, :] >= SEQ - 2, -1, x)   # last 2 slots padded

    params = init_params(k_p, Nsongs, dim, tn=TN)

    # Reparametrization noise eps ~ N(0, 1)  (deterministic via PRNGKey).
    eps = jax.random.normal(k_eps, (B, dim[2]), jnp.float32)

    xhat, (mu, logvar) = vae_forward(x, params, eps, nsongs=Nsongs)
    jax.block_until_ready((xhat, mu, logvar))

    # Correctness check against a pure-JAX reference.
    ref_xhat, ref_mu, ref_logvar = reference_forward(x, params, eps, Nsongs)
    assert xhat.shape == (B, Nsongs)
    assert mu.shape == (B, dim[2]) and logvar.shape == (B, dim[2])
    assert jnp.allclose(mu, ref_mu, rtol=2e-2, atol=2e-2)
    assert jnp.allclose(logvar, ref_logvar, rtol=2e-2, atol=2e-2)
    assert jnp.allclose(xhat, ref_xhat, rtol=2e-2, atol=2e-2)

    print("KERNEL_OK")
</pallas_src>

<mosaic_0001>
module attributes {stable_mosaic.version = 11 : i64} {
  func.func @encoder_latent_kernel(%arg0: memref<8x256xf32, #tpu.memory_space<vmem>>, %arg1: memref<256x128xf32, #tpu.memory_space<vmem>>, %arg2: memref<1x128xf32, #tpu.memory_space<vmem>>, %arg3: memref<128x128xf32, #tpu.memory_space<vmem>>, %arg4: memref<8x64xf32, #tpu.memory_space<vmem>>, %arg5: memref<64x128xf32, #tpu.memory_space<vmem>>, %arg6: memref<1x128xf32, #tpu.memory_space<vmem>>, %arg7: memref<128x256xf32, #tpu.memory_space<vmem>>, %arg8: memref<1x256xf32, #tpu.memory_space<vmem>>, %arg9: memref<8x128xf32, #tpu.memory_space<vmem>>, %arg10: memref<8x256xbf16, #tpu.memory_space<vmem>>) attributes {dimension_semantics = [], scalar_prefetch = 0 : i64, scratch_operands = 0 : i64, tpu.core_type = #tpu.core_type<tc>} {
    %c0 = arith.constant 0 : index
    %c0_0 = arith.constant 0 : index
    %0 = vector.load %arg0[%c0, %c0_0] : memref<8x256xf32, #tpu.memory_space<vmem>>, vector<8x256xf32>
    %cst = arith.constant 0.000000e+00 : f32
    %1 = vector.broadcast %cst : f32 to vector<8x256xf32>
    %2 = arith.maximumf %0, %1 : vector<8x256xf32>
    %c0_1 = arith.constant 0 : index
    %c0_2 = arith.constant 0 : index
    %3 = vector.load %arg1[%c0_1, %c0_2] : memref<256x128xf32, #tpu.memory_space<vmem>>, vector<256x128xf32>
    %cst_3 = arith.constant dense<0.000000e+00> : vector<8x128xf32>
    %4 = tpu.matmul %2, %3, %cst_3 {dimension_numbers = #tpu.dot_dimension_numbers<[1], [0], [0], [1], [0, 0, 1, 1], [], []>} : vector<8x256xf32>, vector<256x128xf32>, vector<8x128xf32> -> vector<8x128xf32>
    %c0_4 = arith.constant 0 : index
    %c0_5 = arith.constant 0 : index
    %5 = vector.load %arg2[%c0_4, %c0_5] : memref<1x128xf32, #tpu.memory_space<vmem>>, vector<1x128xf32>
    %6 = vector.broadcast %5 : vector<1x128xf32> to vector<8x128xf32>
    %7 = arith.addf %4, %6 : vector<8x128xf32>
    %cst_6 = arith.constant 0.000000e+00 : f32
    %8 = vector.broadcast %cst_6 : f32 to vector<8x128xf32>
    %9 = arith.maximumf %7, %8 : vector<8x128xf32>
    %c0_7 = arith.constant 0 : index
    %c0_8 = arith.constant 0 : index
    %10 = vector.load %arg3[%c0_7, %c0_8] : memref<128x128xf32, #tpu.memory_space<vmem>>, vector<128x128xf32>
    %cst_9 = arith.constant dense<0.000000e+00> : vector<8x128xf32>
    %11 = tpu.matmul %9, %10, %cst_9 {dimension_numbers = #tpu.dot_dimension_numbers<[1], [0], [0], [1], [0, 0, 1, 1], [], []>} : vector<8x128xf32>, vector<128x128xf32>, vector<8x128xf32> -> vector<8x128xf32>
    %12 = vector.extract_strided_slice %11 {offsets = [0, 0], sizes = [8, 64], strides = [1, 1]} : vector<8x128xf32> to vector<8x64xf32>
    %13 = vector.extract_strided_slice %11 {offsets = [0, 64], sizes = [8, 64], strides = [1, 1]} : vector<8x128xf32> to vector<8x64xf32>
    %cst_10 = arith.constant 5.000000e-01 : f32
    %14 = vector.broadcast %cst_10 : f32 to vector<8x64xf32>
    %15 = arith.mulf %14, %13 : vector<8x64xf32>
    %16 = math.exp %15 : vector<8x64xf32>
    %c0_11 = arith.constant 0 : index
    %c0_12 = arith.constant 0 : index
    %17 = vector.load %arg4[%c0_11, %c0_12] : memref<8x64xf32, #tpu.memory_space<vmem>>, vector<8x64xf32>
    %18 = arith.mulf %16, %17 : vector<8x64xf32>
    %19 = arith.addf %12, %18 : vector<8x64xf32>
    %c0_13 = arith.constant 0 : index
    %c0_14 = arith.constant 0 : index
    %20 = vector.load %arg5[%c0_13, %c0_14] : memref<64x128xf32, #tpu.memory_space<vmem>>, vector<64x128xf32>
    %cst_15 = arith.constant dense<0.000000e+00> : vector<8x128xf32>
    %21 = tpu.matmul %19, %20, %cst_15 {dimension_numbers = #tpu.dot_dimension_numbers<[1], [0], [0], [1], [0, 0, 1, 1], [], []>} : vector<8x64xf32>, vector<64x128xf32>, vector<8x128xf32> -> vector<8x128xf32>
    %c0_16 = arith.constant 0 : index
    %c0_17 = arith.constant 0 : index
    %22 = vector.load %arg6[%c0_16, %c0_17] : memref<1x128xf32, #tpu.memory_space<vmem>>, vector<1x128xf32>
    %23 = vector.broadcast %22 : vector<1x128xf32> to vector<8x128xf32>
    %24 = arith.addf %21, %23 : vector<8x128xf32>
    %cst_18 = arith.constant 0.000000e+00 : f32
    %25 = vector.broadcast %cst_18 : f32 to vector<8x128xf32>
    %26 = arith.maximumf %24, %25 : vector<8x128xf32>
    %c0_19 = arith.constant 0 : index
    %c0_20 = arith.constant 0 : index
    %27 = vector.load %arg7[%c0_19, %c0_20] : memref<128x256xf32, #tpu.memory_space<vmem>>, vector<128x256xf32>
    %cst_21 = arith.constant dense<0.000000e+00> : vector<8x256xf32>
    %28 = tpu.matmul %26, %27, %cst_21 {dimension_numbers = #tpu.dot_dimension_numbers<[1], [0], [0], [1], [0, 0, 1, 1], [], []>} : vector<8x128xf32>, vector<128x256xf32>, vector<8x256xf32> -> vector<8x256xf32>
    %c0_22 = arith.constant 0 : index
    %c0_23 = arith.constant 0 : index
    %29 = vector.load %arg8[%c0_22, %c0_23] : memref<1x256xf32, #tpu.memory_space<vmem>>, vector<1x256xf32>
    %30 = vector.broadcast %29 : vector<1x256xf32> to vector<8x256xf32>
    %31 = arith.addf %28, %30 : vector<8x256xf32>
    %cst_24 = arith.constant 0.000000e+00 : f32
    %32 = vector.broadcast %cst_24 : f32 to vector<8x256xf32>
    %33 = arith.maximumf %31, %32 : vector<8x256xf32>
    %c0_25 = arith.constant 0 : index
    %c0_26 = arith.constant 0 : index
    %34 = vector.load %arg9[%c0_25, %c0_26] : memref<8x128xf32, #tpu.memory_space<vmem>>, vector<8x128xf32>
    tpu.vector_store %arg9[%c0_25, %c0_26], %11 {strides = array<i32>} : memref<8x128xf32, #tpu.memory_space<vmem>>, vector<8x128xf32>,
    %35 = arith.truncf %33 : vector<8x256xf32> to vector<8x256xbf16>
    %c0_27 = arith.constant 0 : index
    %c0_28 = arith.constant 0 : index
    %36 = vector.load %arg10[%c0_27, %c0_28] : memref<8x256xbf16, #tpu.memory_space<vmem>>, vector<8x256xbf16>
    tpu.vector_store %arg10[%c0_27, %c0_28], %35 {strides = array<i32>} : memref<8x256xbf16, #tpu.memory_space<vmem>>, vector<8x256xbf16>,
    return
  }
}

</mosaic_0001>

<bundles_post_ra>
// kernel: tpu_custom_call.1
= control target key start
LH: loop header
LB: loop body
LE: loop exit
PB: predicated region body
PF: predicated region fallthrough
CT: control target
= control target key end

     0   :  { %16 = vsyncpa [#allocation3], 0  ;;  %s752_s0 = inlined_call_operand.hbm [shape: f32[8,256], index: 0, kind: input, shape index: {}]   ;;  %s753_s1 = inlined_call_operand.hbm [shape: f32[256,128], index: 1, kind: input, shape index: {}]   ;;  %s754_s2 = inlined_call_operand.vmem [shape: f32[1,128], index: 2, kind: input, shape index: {}]   ;;  %s755_s3 = inlined_call_operand.hbm [shape: f32[128,128], index: 3, kind: input, shape index: {}]   ;;  %s756_s4 = inlined_call_operand.hbm [shape: f32[8,64], index: 4, kind: input, shape index: {}]   ;;  %s757_s5 = inlined_call_operand.hbm [shape: f32[64,128], index: 5, kind: input, shape index: {}]   ;;  %s758_s6 = inlined_call_operand.vmem [shape: f32[1,128], index: 6, kind: input, shape index: {}]   ;;  %s759_s7 = inlined_call_operand.hbm [shape: f32[128,256], index: 7, kind: input, shape index: {}]   ;;  %s760_s8 = inlined_call_operand.vmem [shape: f32[1,256], index: 8, kind: input, shape index: {}]   ;;  %s761_s9 = inlined_call_operand.hbm [shape: f32[8,128], index: 9, kind: output, shape index: {0}]   ;;  %s762_s10 = inlined_call_operand.hbm [shape: bf16[8,256], index: 10, kind: output, shape index: {1}]  }
   0x1   :  { %17 = vsyncpa [#allocation6], 0 }
   0x2   :  { %18 = vsyncpa [#allocation9], 0 }
   0x3   :  { %19 = vsyncpa [#allocation12], 0 }
   0x4   :  { %20 = vsyncpa [#allocation4], 0  ;;  %s37_s15 = sshll.u32 %s753_s1, 4  ;;  %s38_s15 = int_to_ptr.hbm [resolvable:$true] %s37_s15 }
   0x5   :  { %21 = vsyncpa [#allocation15], 0  ;;  %s635_s16 = smov [#allocation5]   ;;  %s66_s20 = sshll.u32 %s756_s4, 4  ;;  %s67_s20 = int_to_ptr.hbm [resolvable:$true] %s66_s20 }
   0x6   :  { %s39_s17 = sshll.u32 %s635_s16, 4  ;;  %s636_s21 = smov 128   ;;  %s40_s17 = int_to_ptr.vmem [resolvable:$true] %s39_s17 }
   0x7   :  { %s637_s22 = smov 8   ;;  %s638_s23 = smov [#allocation8]  }
   0x8   :  { %45 = dma.hbm_to_vmem [thread:$0]  %s38_s15, 4096, %s40_s17, [#allocation6], %s636_s21, %s636_s21, %s637_s22  }
   0x9   :  { %s68_s24 = sshll.u32 %s638_s23, 4  ;;  %s27_s26 = sshll.u32 %s752_s0, 4  ;;  %s69_s24 = int_to_ptr.vmem [resolvable:$true] %s68_s24  ;;  %s28_s26 = int_to_ptr.hbm [resolvable:$true] %s27_s26 }
   0xa   :  { %71 = dma.hbm_to_vmem [thread:$0]  %s67_s20, 128, %s69_s24, [#allocation9]  }
   0xb   :  { %s52_s4 = sshll.u32 %s755_s3, 4  ;;  %s639_s29 = smov [#allocation2]   ;;  %s53_s4 = int_to_ptr.hbm [resolvable:$true] %s52_s4 }
   0xc   :  { %s29_s30 = sshll.u32 %s639_s29, 4  ;;  %s640_s11 = smov [#allocation7]   ;;  %s30_s30 = int_to_ptr.vmem [resolvable:$true] %s29_s30 }
   0xd   :  { %32 = dma.hbm_to_vmem [thread:$0]  %s28_s26, 256, %s30_s30, [#allocation3]  }
   0xe   :  { %s54_s12 = sshll.u32 %s640_s11, 4  ;;  %s76_s15 = sshll.u32 %s757_s5, 4  ;;  %s55_s12 = int_to_ptr.vmem [resolvable:$true] %s54_s12  ;;  %s77_s15 = int_to_ptr.hbm [resolvable:$true] %s76_s15 }
   0xf   :  { %60 = dma.hbm_to_vmem [thread:$0]  %s53_s4, 2048, %s55_s12, [#allocation6], %s636_s21, %s636_s21, %s637_s22  }
  0x10   :  { %s91_s3 = sshll.u32 %s759_s7, 4  ;;  %s641_s17 = smov [#allocation10]   ;;  %s92_s3 = int_to_ptr.hbm [resolvable:$true] %s91_s3 }
  0x11   :  { %s78_s18 = sshll.u32 %s641_s17, 4  ;;  %s642_s19 = smov [#allocation11]   ;;  %s79_s18 = int_to_ptr.vmem [resolvable:$true] %s78_s18 }
  0x12   :  { %84 = dma.hbm_to_vmem [thread:$0]  %s77_s15, 1024, %s79_s18, [#allocation9], %s636_s21, %s636_s21, %s637_s22  }
  0x13   :  { %s93_s5 = sshll.u32 %s642_s19, 4  ;;  %s643_s20 = smov 256   ;;  %s94_s5 = int_to_ptr.vmem [resolvable:$true] %s93_s5 }
  0x14   :  { %s644_s23 = smov 16  }
  0x15   :  { %99 = dma.hbm_to_vmem [thread:$0]  %s92_s3, 4096, %s94_s5, [#allocation12], %s643_s20, %s643_s20, %s644_s23  }
  0x16   :  { %623 = dma.done.wait [#allocation3], 256  }
  0x17   :  { %624 = vsyncadd [#allocation3], 4294967040 }
  0x18   :  { %625 = dma.done.wait [#allocation6], 6144  }
  0x19   :  { %626 = vsyncadd [#allocation6], 4294961152 }
  0x1a   :  { %627 = dma.done.wait [#allocation9], 1152  }
  0x1b   :  { %628 = vsyncadd [#allocation9], 4294966144 }
  0x1c   :  { %629 = dma.done.wait [#allocation12], 4096  }
  0x1d   :  { %630 = vsyncadd [#allocation12], 4294963200  ;;  %v145_v0 = vld [vmem:[#allocation5 + $0x78] sm:$0xff]  ;;  %v144_v1 = vld [vmem:[#allocation5 + $0x70] sm:$0xff]  ;;  %s645_s7 = smov 64   ;;  %vm269_vm0 = vcmask 523264  }
  0x1e   :  { %v161_v2 = vld [vmem:[#allocation5 + $0xf8] sm:$0xff]  ;;  %166 = vmatpush.msra.mxu0 %v145_v0  ;;  %v160_v3 = vld [vmem:[#allocation5 + $0xf0] sm:$0xff]  ;;  %v143_v4 = vld [vmem:[#allocation5 + $0x68] sm:$0xff]  ;;  %s646_s25 = smov [#allocation13]   ;;  %s384_s28 = sshll.u32 %s761_s9, 4  ;;  %s385_s28 = int_to_ptr.hbm [resolvable:$true] %s384_s28 }
  0x1f   :  { %186 = vmatpush.msra.mxu1 %v161_v2  ;;  %v159_v5 = vld [vmem:[#allocation5 + $0xe8] sm:$0xff]  ;;  %v142_v6 = vld [vmem:[#allocation5 + $0x60] sm:$0xff]  ;;  %v141_v8 = vld [vmem:[#allocation5 + $0x58] sm:$0xff]  ;;  %s382_s1 = sshll.u32 %s646_s25, 4  ;;  %s395_s13 = sshll.u32 %s762_s10, 4  ;;  %s383_s1 = int_to_ptr.vmem [resolvable:$true] %s382_s1  ;;  %s396_s13 = int_to_ptr.hbm [resolvable:$true] %s395_s13 }
  0x20   :  { %167 = vmatpush.msra.mxu0 %v144_v1  ;;  %v158_v7 = vld [vmem:[#allocation5 + $0xe0] sm:$0xff]  ;;  %v157_v9 = vld [vmem:[#allocation5 + $0xd8] sm:$0xff]  ;;  %v140_v10 = vld [vmem:[#allocation5 + $0x50] sm:$0xff] }
  0x21   :  { %187 = vmatpush.msra.mxu1 %v160_v3  ;;  %v156_v11 = vld [vmem:[#allocation5 + $0xd0] sm:$0xff]  ;;  %v139_v12 = vld [vmem:[#allocation5 + $0x48] sm:$0xff]  ;;  %v222_v14 = vld [vmem:[#allocation7 + $0x78] sm:$0xff] }
  0x22   :  { %168 = vmatpush.msra.mxu0 %v143_v4  ;;  %v155_v13 = vld [vmem:[#allocation5 + $0xc8] sm:$0xff]  ;;  %v221_v15 = vld [vmem:[#allocation7 + $0x70] sm:$0xff]  ;;  %v138_v16 = vld [vmem:[#allocation5 + $0x40] sm:$0xff]  ;;  %223 = vmatpush.msra.mxu2 %v222_v14 }
  0x23   :  { %188 = vmatpush.msra.mxu1 %v159_v5  ;;  %v154_v17 = vld [vmem:[#allocation5 + $0xc0] sm:$0xff]  ;;  %v220_v18 = vld [vmem:[#allocation7 + $0x68] sm:$0xff]  ;;  %v137_v19 = vld [vmem:[#allocation5 + $0x38] sm:$0xff] }
  0x24   :  { %169 = vmatpush.msra.mxu0 %v142_v6  ;;  %v153_v20 = vld [vmem:[#allocation5 + $0xb8] sm:$0xff]  ;;  %224 = vmatpush.msra.mxu2 %v221_v15  ;;  %v219_v21 = vld [vmem:[#allocation7 + $0x60] sm:$0xff]  ;;  %v136_v22 = vld [vmem:[#allocation5 + $0x30] sm:$0xff] }
  0x25   :  { %189 = vmatpush.msra.mxu1 %v158_v7  ;;  %v152_v23 = vld [vmem:[#allocation5 + $0xb0] sm:$0xff]  ;;  %v218_v24 = vld [vmem:[#allocation7 + $0x58] sm:$0xff]  ;;  %v135_v25 = vld [vmem:[#allocation5 + $0x28] sm:$0xff] }
  0x26   :  { %170 = vmatpush.msra.mxu0 %v141_v8  ;;  %225 = vmatpush.msra.mxu2 %v220_v18  ;;  %v151_v26 = vld [vmem:[#allocation5 + $0xa8] sm:$0xff]  ;;  %v217_v27 = vld [vmem:[#allocation7 + $0x50] sm:$0xff]  ;;  %v134_v28 = vld [vmem:[#allocation5 + $0x20] sm:$0xff] }
  0x27   :  { %190 = vmatpush.msra.mxu1 %v157_v9  ;;  %v150_v29 = vld [vmem:[#allocation5 + $0xa0] sm:$0xff]  ;;  %v216_v30 = vld [vmem:[#allocation7 + $0x48] sm:$0xff]  ;;  %v133_v31 = vld [vmem:[#allocation5 + $0x18] sm:$0xff] }
  0x28   :  { %171 = vmatpush.msra.mxu0 %v140_v10  ;;  %226 = vmatpush.msra.mxu2 %v219_v21  ;;  %v149_v32 = vld [vmem:[#allocation5 + $0x98] sm:$0xff]  ;;  %v215_v33 = vld [vmem:[#allocation7 + $0x40] sm:$0xff]  ;;  %v132_v34 = vld [vmem:[#allocation5 + $0x10] sm:$0xff] }
  0x29   :  { %191 = vmatpush.msra.mxu1 %v156_v11  ;;  %v148_v35 = vld [vmem:[#allocation5 + $0x90] sm:$0xff]  ;;  %v127_v37 = vld [vmem:[#allocation2 + $0x8] sm:$0xff]  ;;  %v131_v39 = vld [vmem:[#allocation5 + $0x8] sm:$0xff] }
  0x2a   :  { %172 = vmatpush.msra.mxu0 %v139_v12  ;;  %227 = vmatpush.msra.mxu2 %v218_v24  ;;  %v126_v36 = vld [vmem:[#allocation2] sm:$0xff]  ;;  %v214_v38 = vld [vmem:[#allocation7 + $0x38] sm:$0xff]  ;;  %v147_v40 = vld [vmem:[#allocation5 + $0x88] sm:$0xff]  ;;  %v129_v45 = vmax.f32 %v127_v37, 0.0 }
  0x2b   :  { %192 = vmatpush.msra.mxu1 %v155_v13  ;;  %v213_v41 = vld [vmem:[#allocation7 + $0x30] sm:$0xff]  ;;  %v130_v42 = vld [vmem:[#allocation5] sm:$0xff]  ;;  %v128_v43 = vmax.f32 %v126_v36, 0.0  ;;  %v212_v46 = vld [vmem:[#allocation7 + $0x28] sm:$0xff] }
  0x2c   :  { %173 = vmatpush.msra.mxu0 %v138_v16  ;;  %228 = vmatpush.msra.mxu2 %v217_v27  ;;  %v146_v44 = vld [vmem:[#allocation5 + $0x80] sm:$0xff]  ;;  %v210_v48 = vld [vmem:[#allocation7 + $0x18] sm:$0xff]  ;;  %v209_v49 = vld [vmem:[#allocation7 + $0x10] sm:$0xff] }
  0x2d   :  { %193 = vmatpush.msra.mxu1 %v154_v17  ;;  %v211_v47 = vld [vmem:[#allocation7 + $0x20] sm:$0xff]  ;;  %v208_v50 = vld [vmem:[#allocation7 + $0x8] sm:$0xff]  ;;  %v427_v53 = vld [vmem:[%s754_s2] ss:$0 sm:$0xff] }
  0x2e   :  { %174 = vmatpush.msra.mxu0 %v137_v19  ;;  %229 = vmatpush.msra.mxu2 %v216_v30  ;;  %v207_v51 = vld [vmem:[#allocation7] sm:$0xff]  ;;  %v263_v60 = vld [vmem:[#allocation10 + $0x30] sm:$0xff]  ;;  %v262_v61 = vld [vmem:[#allocation10 + $0x28] sm:$0xff] }
  0x2f   :  { %194 = vmatpush.msra.mxu1 %v153_v20  ;;  %v246_v52 = vld [vmem:[#allocation8] sm:$0xff]  ;;  %v261_v62 = vld [vmem:[#allocation10 + $0x20] sm:$0xff]  ;;  %v259_v0 = vld [vmem:[#allocation10 + $0x10] sm:$0xff] }
  0x30   :  { %175 = vmatpush.msra.mxu0 %v136_v22  ;;  %230 = vmatpush.msra.mxu2 %v215_v33  ;;  %v264_v59 = vld [vmem:[#allocation10 + $0x38] sm:$0xff]  ;;  %v258_v1 = vld [vmem:[#allocation10 + $0x8] sm:$0xff]  ;;  %v257_v8 = vld [vmem:[#allocation10] sm:$0xff] }
  0x31   :  { %195 = vmatpush.msra.mxu1 %v152_v23  ;;  %248 = vrot.lane.b32.xlu0 %v246_v52, %s645_s7  ;;  %v260_v63 = vld [vmem:[#allocation10 + $0x18] sm:$0xff]  ;;  %v324_v9 = vld [vmem:[#allocation11 + $0xf0] sm:$0xff]  ;;  %v322_v11 = vld [vmem:[#allocation11 + $0xe0] sm:$0xff] }
  0x32   :  { %176 = vmatpush.msra.mxu0 %v135_v25  ;;  %231 = vmatpush.msra.mxu2 %v214_v38  ;;  %v325_v10 = vld [vmem:[#allocation11 + $0xf8] sm:$0xff]  ;;  %v323_v12 = vld [vmem:[#allocation11 + $0xe8] sm:$0xff]  ;;  %v320_v13 = vld [vmem:[#allocation11 + $0xd0] sm:$0xff] }
  0x33   :  { %196 = vmatpush.msra.mxu1 %v151_v26  ;;  %281 = vmatpush.msra.mxu3 %v264_v59  ;;  %v321_v14 = vld [vmem:[#allocation11 + $0xd8] sm:$0xff]  ;;  %v318_v15 = vld [vmem:[#allocation11 + $0xc0] sm:$0xff]  ;;  %v319_v16 = vld [vmem:[#allocation11 + $0xc8] sm:$0xff] }
  0x34   :  { %177 = vmatpush.msra.mxu0 %v134_v28  ;;  %232 = vmatpush.msra.mxu2 %v213_v41  ;;  %v316_v17 = vld [vmem:[#allocation11 + $0xb0] sm:$0xff]  ;;  %v317_v18 = vld [vmem:[#allocation11 + $0xb8] sm:$0xff]  ;;  %v314_v19 = vld [vmem:[#allocation11 + $0xa0] sm:$0xff] }
  0x35   :  { %197 = vmatpush.msra.mxu1 %v150_v29  ;;  %282 = vmatpush.msra.mxu3 %v263_v60  ;;  %v315_v20 = vld [vmem:[#allocation11 + $0xa8] sm:$0xff]  ;;  %v312_v21 = vld [vmem:[#allocation11 + $0x90] sm:$0xff]  ;;  %v313_v22 = vld [vmem:[#allocation11 + $0x98] sm:$0xff] }
  0x36   :  { %178 = vmatpush.msra.mxu0 %v133_v31  ;;  %233 = vmatpush.msra.mxu2 %v212_v46  ;;  %v310_v23 = vld [vmem:[#allocation11 + $0x80] sm:$0xff]  ;;  %v311_v24 = vld [vmem:[#allocation11 + $0x88] sm:$0xff]  ;;  %v308_v25 = vld [vmem:[#allocation11 + $0x70] sm:$0xff] }
  0x37   :  { %198 = vmatpush.msra.mxu1 %v149_v32  ;;  %283 = vmatpush.msra.mxu3 %v262_v61  ;;  %v309_v26 = vld [vmem:[#allocation11 + $0x78] sm:$0xff]  ;;  %v306_v27 = vld [vmem:[#allocation11 + $0x60] sm:$0xff]  ;;  %v307_v28 = vld [vmem:[#allocation11 + $0x68] sm:$0xff] }
  0x38   :  { %179 = vmatpush.msra.mxu0 %v132_v34  ;;  %234 = vmatpush.msra.mxu2 %v211_v47  ;;  %v304_v29 = vld [vmem:[#allocation11 + $0x50] sm:$0xff]  ;;  %v305_v30 = vld [vmem:[#allocation11 + $0x58] sm:$0xff]  ;;  %v302_v31 = vld [vmem:[#allocation11 + $0x40] sm:$0xff] }
  0x39   :  { %199 = vmatpush.msra.mxu1 %v148_v35  ;;  %284 = vmatpush.msra.mxu3 %v261_v62  ;;  %v303_v32 = vld [vmem:[#allocation11 + $0x48] sm:$0xff]  ;;  %v300_v33 = vld [vmem:[#allocation11 + $0x30] sm:$0xff]  ;;  %v301_v34 = vld [vmem:[#allocation11 + $0x38] sm:$0xff] }
  0x3a   :  { %180 = vmatpush.msra.mxu0 %v131_v39  ;;  %235 = vmatpush.msra.mxu2 %v210_v48  ;;  %v298_v37 = vld [vmem:[#allocation11 + $0x20] sm:$0xff]  ;;  %v299_v38 = vld [vmem:[#allocation11 + $0x28] sm:$0xff]  ;;  %v296_v39 = vld [vmem:[#allocation11 + $0x10] sm:$0xff] }
  0x3b   :  { %200 = vmatpush.msra.mxu1 %v147_v40  ;;  %285 = vmatpush.msra.mxu3 %v260_v63  ;;  %v297_v40 = vld [vmem:[#allocation11 + $0x18] sm:$0xff]  ;;  %v294_v41 = vld [vmem:[#allocation11] sm:$0xff]  ;;  %v326_v47 = vld [vmem:[%s760_s8] sm:$0x3] }
  0x3c   :  { %181 = vmatpush.msra.mxu0 %v130_v42  ;;  %236 = vmatpush.msra.mxu2 %v209_v49  ;;  %v295_v42 = vld [vmem:[#allocation11 + $0x8] sm:$0xff]  ;;  %v329_v48 = vperm.slane %v326_v47, 1 }
  0x3d   :  { %201 = vmatpush.msra.mxu1 %v146_v44  ;;  %182 = vmatmul.f32.vlgmr.msra.gmra.mxu0 %v128_v43  ;;  %v428_v43 = vld [vmem:[%s758_s6] ss:$0 sm:$0xff]  ;;  %s647_s6 = smov [#allocation14]  }
  0x3e   :  { %202 = vmatmul.f32.vlgmr.msra.gmra.mxu1 %v129_v45  ;;  %237 = vmatpush.msra.mxu2 %v208_v50  ;;  %v328_v50 = vperm.slane %v326_v47, 0  ;;  %s393_s30 = sshll.u32 %s647_s6, 4  ;;  %s394_s30 = int_to_ptr.vmem [resolvable:$true] %s393_s30 }
  0x3f   :  { %286 = vmatpush.msra.mxu3 %v259_v0  ;;  %352 = vmatpush.msrb.mxu0 %v325_v10 }
  0x40   :  { %238 = vmatpush.msra.mxu2 %v207_v51 }
  0x41   :  { %287 = vmatpush.msra.mxu3 %v258_v1  ;;  %353 = vmatpush.msrb.mxu0 %v323_v12 }
  0x43   :  { %288 = vmatpush.msra.mxu3 %v257_v8  ;;  %354 = vmatpush.msrb.mxu0 %v321_v14 }
  0x45   :  { %332 = vmatpush.msrb.mxu3 %v324_v9  ;;  %355 = vmatpush.msrb.mxu0 %v319_v16 }
  0x47   :  { %333 = vmatpush.msrb.mxu3 %v322_v11  ;;  %356 = vmatpush.msrb.mxu0 %v317_v18 }
  0x49   :  { %334 = vmatpush.msrb.mxu3 %v320_v13  ;;  %357 = vmatpush.msrb.mxu0 %v315_v20 }
  0x4b   :  { %335 = vmatpush.msrb.mxu3 %v318_v15  ;;  %358 = vmatpush.msrb.mxu0 %v313_v22 }
  0x4d   :  { %336 = vmatpush.msrb.mxu3 %v316_v17  ;;  %359 = vmatpush.msrb.mxu0 %v311_v24 }
  0x4f   :  { %337 = vmatpush.msrb.mxu3 %v314_v19  ;;  %360 = vmatpush.msrb.mxu0 %v309_v26 }
  0x51   :  { %338 = vmatpush.msrb.mxu3 %v312_v21  ;;  %361 = vmatpush.msrb.mxu0 %v307_v28 }
  0x53   :  { %339 = vmatpush.msrb.mxu3 %v310_v23  ;;  %362 = vmatpush.msrb.mxu0 %v305_v30 }
  0x55   :  { %340 = vmatpush.msrb.mxu3 %v308_v25  ;;  %363 = vmatpush.msrb.mxu0 %v303_v32 }
  0x57   :  { %341 = vmatpush.msrb.mxu3 %v306_v27  ;;  %364 = vmatpush.msrb.mxu0 %v301_v34 }
  0x59   :  { %342 = vmatpush.msrb.mxu3 %v304_v29  ;;  %365 = vmatpush.msrb.mxu0 %v299_v38 }
  0x5b   :  { %343 = vmatpush.msrb.mxu3 %v302_v31  ;;  %366 = vmatpush.msrb.mxu0 %v297_v40 }
  0x5d   :  { %344 = vmatpush.msrb.mxu3 %v300_v33  ;;  %367 = vmatpush.msrb.mxu0 %v295_v42 }
  0x5f   :  { %345 = vmatpush.msrb.mxu3 %v298_v37 }
  0x61   :  { %346 = vmatpush.msrb.mxu3 %v296_v39 }
  0x63   :  { %347 = vmatpush.msrb.mxu3 %v294_v41 }
  0xa3   :  { %v249_v5 = vpop.permute.xlu0 %248 }
  0xba   :  { %v183_v54 = vpop.f32.mrf.mxu0 }
  0xbb   :  { %v203_v55 = vpop.f32.mrf.mxu1  ;;  %v184_v56 = vadd.f32 %v427_v53, %v183_v54 }
  0xbd   :  { %v204_v57 = vadd.f32 %v203_v55, %v184_v56 }
  0xbf   :  { %v206_v58 = vmax.f32 %v204_v57, 0.0 }
  0xc1   :  { %239 = vmatmul.f32.vlgmr.msra.gmra.mxu2 %v206_v58 }
 0x144   :  { %v734_v2 = vpop.f32.mrf.mxu2 }
 0x145   :  { %v243_v3 = vmul.f32 0.5, %v734_v2  ;;  %374 = vst [vmem:[#allocation13] sm:$0xff] %v734_v2 }
 0x146   :  { %387 = dma.vmem_to_hbm [thread:$0]  %s383_s1, 128, %s385_s28, [#allocation4]  }
 0x147   :  { %v244_v4 = vmul.f32 1.442695, %v243_v3 }
 0x149   :  { %429 = vpow2.f32 %v244_v4 }
 0x14f   :  { %v430_v6 = vpop.eup %429 }
 0x150   :  { %v251_v7 = vmul.f32 %v430_v6, %v249_v5 }
 0x152   :  { %253 = vrot.lane.b32.xlu0 %v251_v7, %s645_s7 }
 0x1c4   :  { %v254_v35 = vpop.permute.xlu0 %253 }
 0x1c5   :  { %v256_v36 = vadd.f32 %v254_v35, %v734_v2 }
 0x1c7   :  { %413 = vmatmul.msk.f32.vlgmr.msra.gmra.mxu3 %vm269_vm0, %v256_v36 }
 0x24a   :  { %v290_v44 = vpop.f32.mrf.mxu3 }
 0x24b   :  { %v291_v45 = vadd.f32 %v428_v43, %v290_v44 }
 0x24d   :  { %v293_v46 = vmax.f32 %v291_v45, 0.0 }
 0x24f   :  { %348 = vmatmul.f32.vlgmr.msrb.gmra.mxu3 %v293_v46  ;;  %368 = vmatmul.f32.vlgmr.msrb.gmra.mxu0 %v293_v46 }
 0x2cc   :  { %v369_v49 = vpop.f32.mrf.mxu0 }
 0x2cd   :  { %v370_v51 = vadd.f32 %v369_v49, %v329_v48 }
 0x2cf   :  { %v373_v54 = vmax.f32 %v370_v51, 0.0 }
 0x2d2   :  { %v349_v52 = vpop.f32.mrf.mxu3 }
 0x2d3   :  { %v350_v53 = vadd.f32 %v349_v52, %v328_v50 }
 0x2d5   :  { %v372_v55 = vmax.f32 %v350_v53, 0.0 }
 0x2d7   :  { %v375_v56 = vpack.c.bf16 %v373_v54, %v372_v55 }
 0x2d9   :  { %376 = vst [vmem:[#allocation14] sm:$0xff] %v375_v56 }
 0x2da   :  { %398 = dma.vmem_to_hbm [thread:$0]  %s394_s30, 128, %s396_s13, [#allocation15]  }
 0x2db   :  { %631 = dma.done.wait [#allocation4], 128  }
 0x2dc   :  { %632 = vsyncadd [#allocation4], 4294967168 }
 0x2dd   :  { %633 = dma.done.wait [#allocation15], 128  }
 0x2de   :  { %634 = vsyncadd [#allocation15], 4294967168 }
 0x2df   :  { %407 = vsyncpa [#allocation3], 1 }
 0x2e0   :  { %408 = vsyncpa [#allocation6], 1 }
 0x2e1   :  { %409 = vsyncpa [#allocation9], 1 }
 0x2e2   :  { %410 = vsyncpa [#allocation12], 1 }
 0x2e3   :  { %411 = vsyncpa [#allocation4], 1 }
 0x2e4   :  { %412 = vsyncpa [#allocation15], 1 }

</bundles_post_ra>
